<compile_context>
chip_gen: v7x
topology: tpu7x:2x2x1
jax: 0.10.0
libtpu: 0.0.40
codegen_flags: <defaults>
</compile_context>

<pallas_src>
import functools

import jax
import jax.numpy as jnp
from jax.experimental import pallas as pl
from jax.experimental.pallas import tpu as pltpu


# ----------------------------------------------------------------------------
# Pallas kernel (lane-folded): ReLU(x @ Wp_blk + bp) @ Wt_blk + bt, then an
# exact 2-class softmax via sigmoid of the per-user logit difference.
# Weights are (in_features, out_features); `fold` = #users packed per row.
# ----------------------------------------------------------------------------
def teachernet_kernel(x_ref, wp_ref, bp_ref, wt_ref, bt_ref, out_ref, *, fold):
    G = fold

    # Properties module: Linear(property_size -> output_size) + ReLU.
    # TODO(synk): exact `Properties` internals are not given in the reference;
    # a single Linear + ReLU is assumed (dropout is identity in eval mode).
    h = jnp.dot(x_ref[...], wp_ref[...],
                preferred_element_type=jnp.float32) + bp_ref[...]
    h = jnp.maximum(h, 0.0)

    # Collapsed, activation-free tail (fusion -> mlp chain), block-diagonal
    # over the lane fold. Lanes [0:G] = logit0 per folded user, [G:2G] = logit1.
    lcat = jnp.dot(h, wt_ref[...],
                   preferred_element_type=jnp.float32) + bt_ref[...]
    out_ref[:, : 2 * G] = lcat

    # Exact 2-class softmax: p0 = sigmoid(l0 - l1), p1 = sigmoid(l1 - l0).
    d = lcat[:, :G] - lcat[:, G: 2 * G]
    out_ref[:, 2 * G: 3 * G] = jax.nn.sigmoid(d)
    out_ref[:, 3 * G:] = jax.nn.sigmoid(-d)


# ----------------------------------------------------------------------------
# Wrapper
# ----------------------------------------------------------------------------
def _round_up(x, m):
    return ((x + m - 1) // m) * m


def teachernet_forward(properties, params, *, tile_rows=32768):
    """properties: (B, property_size); params: dict of (W, b) pairs (in, out)."""
    B, P = properties.shape

    Wp, bp = params["prop"]
    Wf, bf = params["fusion"]
    W0, b0 = params["mlp0"]
    W1, b1 = params["mlp1"]
    W2, b2 = params["mlp2"]

    O = Wp.shape[1]
    NC = W2.shape[1]
    assert NC == 2, "TeacherNet final layer is 2-wide (2-class softmax)."

    # Algebraically collapse the activation-free tail into one matmul + bias.
    W_tail = Wf @ W0 @ W1 @ W2                         # (O, 2)
    b_tail = ((bf @ W0 + b0) @ W1 + b1) @ W2 + b2      # (2,)

    # Lane-fold factor: pack G consecutive users into the 128-lane axis.
    G = max(1, 128 // P) if P <= 128 else 1

    # Block-diagonal per-group weights (one-time wrapper-side cost).
    if G > 1:
        Wp_blk = jax.scipy.linalg.block_diag(*([Wp] * G))            # (G*P, G*O)
        Wl0 = jax.scipy.linalg.block_diag(*([W_tail[:, 0:1]] * G))   # (G*O, G)
        Wl1 = jax.scipy.linalg.block_diag(*([W_tail[:, 1:2]] * G))   # (G*O, G)
    else:
        Wp_blk, Wl0, Wl1 = Wp, W_tail[:, 0:1], W_tail[:, 1:2]
    bp_blk = jnp.tile(bp.reshape(1, -1), (1, G))                     # (1, G*O)
    Wt_blk = jnp.concatenate([Wl0, Wl1], axis=1)                     # (G*O, 2G)
    bt_blk = jnp.tile(b_tail.reshape(2, 1), (1, G)).reshape(1, 2 * G)

    # Batch padding / tiling (all static). Folded rows are multiples of 8.
    B1 = _round_up(B, 8 * G)
    R = B1 // G                                        # folded rows
    tile_fold = max(8, (tile_rows // G) // 8 * 8)
    if R <= 16:
        tm = R                                         # tiny batch: one tile
    else:
        # >= 2 grid steps so v7x megacore has something to shard, capped so
        # tiles stay small in VMEM on all generations.
        tm = min(tile_fold, _round_up((R + 1) // 2, 8))
    R_pad = _round_up(R, tm)
    B_pad = R_pad * G

    x = properties                                     # stream incoming dtype
    if B_pad != B:
        x = jnp.pad(x, ((0, B_pad - B), (0, 0)))
    x_fold = x.reshape(R_pad, G * P)                   # free, lane-dense view

    itemsize = jnp.dtype(x_fold.dtype).itemsize
    cost = pl.CostEstimate(
        flops=int(2 * B_pad * (P * O + O * NC)),
        transcendentals=int(2 * B_pad),
        bytes_accessed=int(x_fold.size * itemsize
                           + R_pad * 4 * G * 4
                           + 4 * (Wp_blk.size + bp_blk.size
                                  + Wt_blk.size + bt_blk.size)),
    )

    out = pl.pallas_call(
        functools.partial(teachernet_kernel, fold=G),
        out_shape=jax.ShapeDtypeStruct((R_pad, 4 * G), jnp.float32),
        grid=(R_pad // tm,),
        in_specs=[
            pl.BlockSpec((tm, G * P), lambda i: (i, 0)),   # x tiles stream
            pl.BlockSpec((G * P, G * O), lambda i: (0, 0)),  # weights resident
            pl.BlockSpec((1, G * O), lambda i: (0, 0)),
            pl.BlockSpec((G * O, 2 * G), lambda i: (0, 0)),
            pl.BlockSpec((1, 2 * G), lambda i: (0, 0)),
        ],
        out_specs=pl.BlockSpec((tm, 4 * G), lambda i: (i, 0)),
        compiler_params=pltpu.CompilerParams(
            dimension_semantics=("parallel",)),
        cost_estimate=cost,
    )(x_fold, Wp_blk, bp_blk, Wt_blk, bt_blk)

    # Un-fold: slab layout is [l0 | l1 | p0 | p1], each G lanes wide; the
    # row-major reshape recovers per-user order.
    l0 = out[:, 0:G].reshape(-1)[:B]
    l1 = out[:, G:2 * G].reshape(-1)[:B]
    p0 = out[:, 2 * G:3 * G].reshape(-1)[:B]
    p1 = out[:, 3 * G:4 * G].reshape(-1)[:B]
    return {"logit": jnp.stack([l0, l1], axis=1),
            "output": jnp.stack([p0, p1], axis=1)}


# ----------------------------------------------------------------------------
# Deterministic parameter init (xavier-uniform, matching reset_parameters).
# Weights are generated in PyTorch (out, in) convention then transposed.
# ----------------------------------------------------------------------------
def xavier_uniform(key, out_features, in_features):
    bound = (6.0 / (in_features + out_features)) ** 0.5
    W = jax.random.uniform(key, (out_features, in_features),
                           minval=-bound, maxval=bound, dtype=jnp.float32)
    return W.T  # -> (in, out)


def make_params(key, property_size, output_size, hidden_size):
    keys = jax.random.split(key, 5)
    return {
        "prop":   (xavier_uniform(keys[0], output_size, property_size),
                   jnp.zeros((output_size,), jnp.float32)),
        "fusion": (xavier_uniform(keys[1], output_size, output_size),
                   jnp.zeros((output_size,), jnp.float32)),
        "mlp0":   (xavier_uniform(keys[2], hidden_size, output_size),
                   jnp.zeros((hidden_size,), jnp.float32)),
        "mlp1":   (xavier_uniform(keys[3], hidden_size, hidden_size),
                   jnp.zeros((hidden_size,), jnp.float32)),
        "mlp2":   (xavier_uniform(keys[4], 2, hidden_size),
                   jnp.zeros((2,), jnp.float32)),
    }


# ----------------------------------------------------------------------------
# Pure-JAX reference (uncollapsed, layer-by-layer) for a sanity check
# ----------------------------------------------------------------------------
def teachernet_ref(x, params):
    def lin(h, name):
        W, b = params[name]
        return h @ W + b
    h = jnp.maximum(lin(x, "prop"), 0.0)
    h = lin(h, "fusion")
    h = lin(h, "mlp0")
    h = lin(h, "mlp1")
    logits = lin(h, "mlp2")
    return logits, jax.nn.softmax(logits, axis=1)


if __name__ == "__main__":
    # Small config consistent with the module:
    #   num_mlp_layers = 3, property_size = 16, output_size = 32, hidden = 32
    B, PROPERTY_SIZE, OUTPUT_SIZE, HIDDEN_SIZE = 8, 16, 32, 32

    key = jax.random.PRNGKey(0)
    k_x, k_p = jax.random.split(key)
    properties = jax.random.normal(k_x, (B, PROPERTY_SIZE), dtype=jnp.float32)
    params = make_params(k_p, PROPERTY_SIZE, OUTPUT_SIZE, HIDDEN_SIZE)

    results = teachernet_forward(properties, params)
    jax.block_until_ready(results)

    # Correctness check against the pure-JAX layer-by-layer reference.
    ref_logits, ref_probs = teachernet_ref(properties, params)
    assert jnp.allclose(results["logit"], ref_logits, atol=1e-3, rtol=1e-3), \
        "logit mismatch vs reference"
    assert jnp.allclose(results["output"], ref_probs, atol=1e-3, rtol=1e-3), \
        "softmax mismatch vs reference"
    assert jnp.allclose(jnp.sum(results["output"], axis=1), 1.0, atol=1e-3)

    print("KERNEL_OK")
</pallas_src>

<mosaic_0001>
module attributes {stable_mosaic.version = 11 : i64} {
  func.func @teachernet_kernel(%arg0: i32, %arg1: memref<8x128xf32, #tpu.memory_space<vmem>>, %arg2: memref<128x256xf32, #tpu.memory_space<vmem>>, %arg3: memref<1x256xf32, #tpu.memory_space<vmem>>, %arg4: memref<256x16xf32, #tpu.memory_space<vmem>>, %arg5: memref<1x16xf32, #tpu.memory_space<vmem>>, %arg6: memref<8x32xf32, #tpu.memory_space<vmem>>) attributes {dimension_semantics = [#tpu.dimension_semantics<parallel>], iteration_bounds = array<i64: 1>, scalar_prefetch = 0 : i64, scratch_operands = 0 : i64, tpu.core_type = #tpu.core_type<tc>, window_params = [{transform_indices = @transform_0, window_bounds = array<i64: 8, 128>}, {pipeline_mode = #tpu.pipeline_mode<synchronous>, transform_indices = @transform_1, window_bounds = array<i64: 128, 256>}, {pipeline_mode = #tpu.pipeline_mode<synchronous>, transform_indices = @transform_2, window_bounds = array<i64: 1, 256>}, {pipeline_mode = #tpu.pipeline_mode<synchronous>, transform_indices = @transform_3, window_bounds = array<i64: 256, 16>}, {pipeline_mode = #tpu.pipeline_mode<synchronous>, transform_indices = @transform_4, window_bounds = array<i64: 1, 16>}, {transform_indices = @transform_5, window_bounds = array<i64: 8, 32>}]} {
    %c0 = arith.constant 0 : index
    %c0_0 = arith.constant 0 : index
    %0 = vector.load %arg1[%c0, %c0_0] : memref<8x128xf32, #tpu.memory_space<vmem>>, vector<8x128xf32>
    %c0_1 = arith.constant 0 : index
    %c0_2 = arith.constant 0 : index
    %1 = vector.load %arg2[%c0_1, %c0_2] : memref<128x256xf32, #tpu.memory_space<vmem>>, vector<128x256xf32>
    %cst = arith.constant dense<0.000000e+00> : vector<8x256xf32>
    %2 = tpu.matmul %0, %1, %cst {dimension_numbers = #tpu.dot_dimension_numbers<[1], [0], [0], [1], [0, 0, 1, 1], [], []>} : vector<8x128xf32>, vector<128x256xf32>, vector<8x256xf32> -> vector<8x256xf32>
    %c0_3 = arith.constant 0 : index
    %c0_4 = arith.constant 0 : index
    %3 = vector.load %arg3[%c0_3, %c0_4] : memref<1x256xf32, #tpu.memory_space<vmem>>, vector<1x256xf32>
    %4 = vector.broadcast %3 : vector<1x256xf32> to vector<8x256xf32>
    %5 = arith.addf %2, %4 : vector<8x256xf32>
    %cst_5 = arith.constant 0.000000e+00 : f32
    %6 = vector.broadcast %cst_5 : f32 to vector<8x256xf32>
    %7 = arith.maximumf %5, %6 : vector<8x256xf32>
    %c0_6 = arith.constant 0 : index
    %c0_7 = arith.constant 0 : index
    %8 = vector.load %arg4[%c0_6, %c0_7] : memref<256x16xf32, #tpu.memory_space<vmem>>, vector<256x16xf32>
    %cst_8 = arith.constant dense<0.000000e+00> : vector<8x16xf32>
    %9 = tpu.matmul %7, %8, %cst_8 {dimension_numbers = #tpu.dot_dimension_numbers<[1], [0], [0], [1], [0, 0, 1, 1], [], []>} : vector<8x256xf32>, vector<256x16xf32>, vector<8x16xf32> -> vector<8x16xf32>
    %c0_9 = arith.constant 0 : index
    %c0_10 = arith.constant 0 : index
    %10 = vector.load %arg5[%c0_9, %c0_10] : memref<1x16xf32, #tpu.memory_space<vmem>>, vector<1x16xf32>
    %11 = vector.broadcast %10 : vector<1x16xf32> to vector<8x16xf32>
    %12 = arith.addf %9, %11 : vector<8x16xf32>
    %c0_11 = arith.constant 0 : index
    %c0_12 = arith.constant 0 : index
    %13 = vector.load %arg6[%c0_11, %c0_12] : memref<8x32xf32, #tpu.memory_space<vmem>>, vector<8x16xf32>
    tpu.vector_store %arg6[%c0_11, %c0_12], %12 {strides = array<i32>} : memref<8x32xf32, #tpu.memory_space<vmem>>, vector<8x16xf32>,
    %14 = vector.extract_strided_slice %12 {offsets = [0, 0], sizes = [8, 8], strides = [1, 1]} : vector<8x16xf32> to vector<8x8xf32>
    %15 = vector.extract_strided_slice %12 {offsets = [0, 8], sizes = [8, 8], strides = [1, 1]} : vector<8x16xf32> to vector<8x8xf32>
    %16 = arith.subf %14, %15 : vector<8x8xf32>
    %17 = arith.negf %16 : vector<8x8xf32>
    %18 = math.exp %17 : vector<8x8xf32>
    %cst_13 = arith.constant 1.000000e+00 : f32
    %19 = vector.broadcast %cst_13 : f32 to vector<8x8xf32>
    %20 = arith.addf %19, %18 : vector<8x8xf32>
    %21 = arith.divf %19, %20 : vector<8x8xf32>
    %c0_14 = arith.constant 0 : index
    %c16 = arith.constant 16 : index
    %22 = vector.load %arg6[%c0_14, %c16] : memref<8x32xf32, #tpu.memory_space<vmem>>, vector<8x8xf32>
    tpu.vector_store %arg6[%c0_14, %c16], %21 {strides = array<i32>} : memref<8x32xf32, #tpu.memory_space<vmem>>, vector<8x8xf32>,
    %cst_15 = arith.constant 0.000000e+00 : f32
    %23 = vector.broadcast %cst_15 : f32 to vector<8x8xf32>
    %24 = arith.subf %23, %16 : vector<8x8xf32>
    %25 = arith.negf %24 : vector<8x8xf32>
    %26 = math.exp %25 : vector<8x8xf32>
    %cst_16 = arith.constant 1.000000e+00 : f32
    %27 = vector.broadcast %cst_16 : f32 to vector<8x8xf32>
    %28 = arith.addf %27, %26 : vector<8x8xf32>
    %29 = arith.divf %27, %28 : vector<8x8xf32>
    %c0_17 = arith.constant 0 : index
    %c24 = arith.constant 24 : index
    %30 = vector.load %arg6[%c0_17, %c24] : memref<8x32xf32, #tpu.memory_space<vmem>>, vector<8x8xf32>
    tpu.vector_store %arg6[%c0_17, %c24], %29 {strides = array<i32>} : memref<8x32xf32, #tpu.memory_space<vmem>>, vector<8x8xf32>,
    return
  }
  func.func @transform_0(%arg0: i32) -> (i32, i32) {
    %c0_i32 = arith.constant 0 : i32
    %c0_i32_0 = arith.constant 0 : i32
    return %arg0, %c0_i32 : i32, i32
  }
  func.func @transform_1(%arg0: i32) -> (i32, i32) {
    %c0_i32 = arith.constant 0 : i32
    %c0_i32_0 = arith.constant 0 : i32
    %c0_i32_1 = arith.constant 0 : i32
    return %c0_i32, %c0_i32_0 : i32, i32
  }
  func.func @transform_2(%arg0: i32) -> (i32, i32) {
    %c0_i32 = arith.constant 0 : i32
    %c0_i32_0 = arith.constant 0 : i32
    %c0_i32_1 = arith.constant 0 : i32
    return %c0_i32, %c0_i32_0 : i32, i32
  }
  func.func @transform_3(%arg0: i32) -> (i32, i32) {
    %c0_i32 = arith.constant 0 : i32
    %c0_i32_0 = arith.constant 0 : i32
    %c0_i32_1 = arith.constant 0 : i32
    return %c0_i32, %c0_i32_0 : i32, i32
  }
  func.func @transform_4(%arg0: i32) -> (i32, i32) {
    %c0_i32 = arith.constant 0 : i32
    %c0_i32_0 = arith.constant 0 : i32
    %c0_i32_1 = arith.constant 0 : i32
    return %c0_i32, %c0_i32_0 : i32, i32
  }
  func.func @transform_5(%arg0: i32) -> (i32, i32) {
    %c0_i32 = arith.constant 0 : i32
    %c0_i32_0 = arith.constant 0 : i32
    return %arg0, %c0_i32 : i32, i32
  }
}

</mosaic_0001>

<bundles_post_ra>
// kernel: tpu_custom_call.1
= control target key start
LH: loop header
LB: loop body
LE: loop exit
PB: predicated region body
PF: predicated region fallthrough
CT: control target
= control target key end

     0   :  { %v433_v7 = vmov 0.0   ;;  %s681_s0 = inlined_call_operand.vmem [shape: f32[8,128], index: 0, kind: input, shape index: {}]   ;;  %s682_s1 = inlined_call_operand.vmem [shape: f32[128,256], index: 1, kind: input, shape index: {}]   ;;  %s683_s2 = inlined_call_operand.vmem [shape: f32[1,256], index: 2, kind: input, shape index: {}]   ;;  %s684_s3 = inlined_call_operand.vmem [shape: f32[256,16], index: 3, kind: input, shape index: {}]   ;;  %s685_s4 = inlined_call_operand.vmem [shape: f32[1,16], index: 4, kind: input, shape index: {}]   ;;  %s686_s5 = inlined_call_operand.hbm [shape: f32[8,32], index: 5, kind: output, shape index: {}]  }
   0x1   :  { %v23_v0 = vld [vmem:[%s682_s1 + $0x8] sm:$0xff]  ;;  %v25_v1 = vld [vmem:[%s682_s1 + $0x18] sm:$0xff]  ;;  %v22_v2 = vld [vmem:[%s682_s1] sm:$0xff]  ;;  %130 = vmatprep.mubr.f32.mxu0 %v433_v7 }
   0x2   :  { %v332_v3 = vpack.c.bf16 %v25_v1, %v23_v0  ;;  %v24_v4 = vld [vmem:[%s682_s1 + $0x10] sm:$0xff]  ;;  %v27_v5 = vld [vmem:[%s682_s1 + $0x28] sm:$0xff]  ;;  %v29_v6 = vld [vmem:[%s682_s1 + $0x38] sm:$0xff] }
   0x3   :  { %v334_v8 = vpack.c.bf16 %v24_v4, %v22_v2  ;;  %v336_v9 = vpack.c.bf16 %v29_v6, %v27_v5  ;;  %v26_v10 = vld [vmem:[%s682_s1 + $0x20] sm:$0xff]  ;;  %v28_v11 = vld [vmem:[%s682_s1 + $0x30] sm:$0xff]  ;;  %v31_v12 = vld [vmem:[%s682_s1 + $0x48] sm:$0xff] }
   0x4   :  { %333 = vmatprep.subr.bf16.mxu0 %v332_v3  ;;  %v33_v13 = vld [vmem:[%s682_s1 + $0x58] sm:$0xff]  ;;  %v338_v14 = vpack.c.bf16 %v28_v11, %v26_v10  ;;  %v30_v16 = vld [vmem:[%s682_s1 + $0x40] sm:$0xff]  ;;  %v32_v17 = vld [vmem:[%s682_s1 + $0x50] sm:$0xff] }
   0x5   :  { %335 = vmatpush1.bf16.msra.mxu0 %v334_v8  ;;  %v340_v15 = vpack.c.bf16 %v33_v13, %v31_v12  ;;  %v35_v18 = vld [vmem:[%s682_s1 + $0x68] sm:$0xff]  ;;  %v37_v19 = vld [vmem:[%s682_s1 + $0x78] sm:$0xff]  ;;  %v342_v20 = vpack.c.bf16 %v32_v17, %v30_v16  ;;  %v34_v22 = vld [vmem:[%s682_s1 + $0x60] sm:$0xff] }
   0x6   :  { %337 = vmatprep.subr.bf16.mxu0 %v336_v9  ;;  %v344_v21 = vpack.c.bf16 %v37_v19, %v35_v18  ;;  %v36_v23 = vld [vmem:[%s682_s1 + $0x70] sm:$0xff]  ;;  %v39_v24 = vld [vmem:[%s682_s1 + $0x88] sm:$0xff]  ;;  %v41_v25 = vld [vmem:[%s682_s1 + $0x98] sm:$0xff] }
   0x7   :  { %v38_v26 = vld [vmem:[%s682_s1 + $0x80] sm:$0xff]  ;;  %v40_v27 = vld [vmem:[%s682_s1 + $0x90] sm:$0xff]  ;;  %v156_v29 = vld [vmem:[%s684_s3 + $0x88] sm:$0xff]  ;;  %v346_v31 = vpack.c.bf16 %v36_v23, %v34_v22  ;;  %v348_v36 = vpack.c.bf16 %v41_v25, %v39_v24 }
   0x8   :  { %v155_v28 = vld [vmem:[%s684_s3 + $0x80] sm:$0xff]  ;;  %v140_v33 = vld [vmem:[%s684_s3 + $0x8] sm:$0xff]  ;;  %v157_v34 = vld [vmem:[%s684_s3 + $0x90] sm:$0xff]  ;;  %v350_v46 = vpack.c.bf16 %v40_v27, %v38_v26 }
   0x9   :  { %339 = vmatpush1.bf16.msra.mxu0 %v338_v14  ;;  %v139_v30 = vld [vmem:[%s684_s3] sm:$0xff]  ;;  %v364_v32 = vpack.c.bf16 %v156_v29, %v155_v28  ;;  %v158_v35 = vld [vmem:[%s684_s3 + $0x98] sm:$0xff]  ;;  %v141_v39 = vld [vmem:[%s684_s3 + $0x10] sm:$0xff] }
   0xa   :  { %341 = vmatprep.subr.bf16.mxu0 %v340_v15  ;;  %v366_v37 = vpack.c.bf16 %v140_v33, %v139_v30  ;;  %v368_v38 = vpack.c.bf16 %v158_v35, %v157_v34  ;;  %v142_v40 = vld [vmem:[%s684_s3 + $0x18] sm:$0xff]  ;;  %v159_v41 = vld [vmem:[%s684_s3 + $0xa0] sm:$0xff]  ;;  %v43_v42 = vld [vmem:[%s682_s1 + $0xa8] sm:$0xff] }
   0xb   :  { %v45_v43 = vld [vmem:[%s682_s1 + $0xb8] sm:$0xff]  ;;  %365 = vmatprep.subr.bf16.mxu1 %v364_v32  ;;  %v160_v44 = vld [vmem:[%s684_s3 + $0xa8] sm:$0xff]  ;;  %v370_v45 = vpack.c.bf16 %v142_v40, %v141_v39  ;;  %v42_v47 = vld [vmem:[%s682_s1 + $0xa0] sm:$0xff] }
   0xc   :  { %367 = vmatpush3.bf16.msra.mxu1 %v366_v37  ;;  %v372_v48 = vpack.c.bf16 %v160_v44, %v159_v41  ;;  %v143_v49 = vld [vmem:[%s684_s3 + $0x20] sm:$0xff]  ;;  %v144_v50 = vld [vmem:[%s684_s3 + $0x28] sm:$0xff]  ;;  %v352_v51 = vpack.c.bf16 %v45_v43, %v43_v42  ;;  %v44_v52 = vld [vmem:[%s682_s1 + $0xb0] sm:$0xff] }
   0xd   :  { %343 = vmatpush1.bf16.msra.mxu0 %v342_v20  ;;  %369 = vmatprep.subr.bf16.mxu1 %v368_v38  ;;  %v161_v53 = vld [vmem:[%s684_s3 + $0xb0] sm:$0xff]  ;;  %v162_v54 = vld [vmem:[%s684_s3 + $0xb8] sm:$0xff]  ;;  %v47_v55 = vld [vmem:[%s682_s1 + $0xc8] sm:$0xff]  ;;  %v374_v58 = vpack.c.bf16 %v144_v50, %v143_v49  ;;  %v354_v59 = vpack.c.bf16 %v44_v52, %v42_v47 }
   0xe   :  { %345 = vmatprep.subr.bf16.mxu0 %v344_v21  ;;  %v49_v56 = vld [vmem:[%s682_s1 + $0xd8] sm:$0xff]  ;;  %v46_v57 = vld [vmem:[%s682_s1 + $0xc0] sm:$0xff]  ;;  %v376_v60 = vpack.c.bf16 %v162_v54, %v161_v53  ;;  %v145_v61 = vld [vmem:[%s684_s3 + $0x30] sm:$0xff] }
   0xf   :  { %v146_v62 = vld [vmem:[%s684_s3 + $0x38] sm:$0xff] }
  0x10   :  { %371 = vmatpush3.bf16.msra.mxu1 %v370_v45 }
  0x11   :  { %347 = vmatpush1.bf16.msra.mxu0 %v346_v31  ;;  %373 = vmatprep.subr.bf16.mxu1 %v372_v48 }
  0x12   :  { %349 = vmatprep.subr.bf16.mxu0 %v348_v36 }
  0x15   :  { %351 = vmatpush1.bf16.msra.mxu0 %v350_v46 }
  0x16   :  { %10 = vsyncpa [#allocation3], 0  ;;  %353 = vmatprep.subr.bf16.mxu0 %v352_v51  ;;  %v356_v63 = vpack.c.bf16 %v49_v56, %v47_v55  ;;  %v48_v0 = vld [vmem:[%s682_s1 + $0xd0] sm:$0xff]  ;;  %v163_v1 = vld [vmem:[%s684_s3 + $0xc0] sm:$0xff]  ;;  %375 = vmatpush3.bf16.msra.mxu1 %v374_v58  ;;  %v378_v5 = vpack.c.bf16 %v146_v62, %v145_v61  ;;  %v56_v34 = vlaneseq  ;;  %vm248_vm0 = vcmask 130048   ;;  %s436_s24 = smov 24  }
  0x17   :  { %v164_v2 = vld [vmem:[%s684_s3 + $0xc8] sm:$0xff]  ;;  %v53_v4 = vld [vmem:[%s682_s1 + $0xf8] sm:$0xff]  ;;  %v358_v6 = vpack.c.bf16 %v48_v0, %v46_v57  ;;  %v50_v7 = vld [vmem:[%s682_s1 + $0xe0] sm:$0xff]  ;;  %377 = vmatprep.subr.bf16.mxu1 %v376_v60  ;;  %vm265_vm1 = vcmask 195712   ;;  %s437_s25 = smov [#allocation2]   ;;  %vm278_vm2 = vcmask 261312  }
  0x18   :  { %v51_v3 = vld [vmem:[%s682_s1 + $0xe8] sm:$0xff]  ;;  %v380_v8 = vpack.c.bf16 %v164_v2, %v163_v1  ;;  %v147_v9 = vld [vmem:[%s684_s3 + $0x40] sm:$0xff]  ;;  %v52_v12 = vld [vmem:[%s682_s1 + $0xf0] sm:$0xff]  ;;  %v57_v35 = vshrl.u32 %v56_v34, 7  ;;  %s286_s26 = sshll.u32 %s437_s25, 4  ;;  %s287_s26 = int_to_ptr.vmem [resolvable:$true] %s286_s26 }
  0x19   :  { %355 = vmatpush1.bf16.msra.mxu0 %v354_v59  ;;  %v148_v10 = vld [vmem:[%s684_s3 + $0x48] sm:$0xff]  ;;  %v360_v11 = vpack.c.bf16 %v53_v4, %v51_v3  ;;  %v165_v13 = vld [vmem:[%s684_s3 + $0xd0] sm:$0xff]  ;;  %v166_v14 = vld [vmem:[%s684_s3 + $0xd8] sm:$0xff]  ;;  %v362_v16 = vpack.c.bf16 %v52_v12, %v50_v7  ;;  %s409_s27 = scalar_lea.vmem %s287_s26, 128  ;;  %p414_p1 = scmp.lt.s32.totalorder %s287_s26, %s287_s26 }
  0x1a   :  { %357 = vmatprep.subr.bf16.mxu0 %v356_v63  ;;  %379 = vmatpush3.bf16.msra.mxu1 %v378_v5  ;;  %v382_v15 = vpack.c.bf16 %v148_v10, %v147_v9  ;;  %v384_v17 = vpack.c.bf16 %v166_v14, %v165_v13  ;;  %v149_v18 = vld [vmem:[%s684_s3 + $0x50] sm:$0xff]  ;;  %v150_v19 = vld [vmem:[%s684_s3 + $0x58] sm:$0xff]  ;;  %v167_v20 = vld [vmem:[%s684_s3 + $0xe0] sm:$0xff]  ;;  %v58_v36 = vsub.s32 0, %v57_v35  ;;  %v62_v38 = vsub.s32 1, %v57_v35  ;;  %p410_p0 = scmp.ne.s32.totalorder %s287_s26, %s409_s27  ;;  %p415_p2 = scmp.lt.s32.totalorder %s409_s27, %s409_s27 }
  0x1b   :  { %381 = vmatprep.subr.bf16.mxu1 %v380_v8  ;;  %v168_v21 = vld [vmem:[%s684_s3 + $0xe8] sm:$0xff]  ;;  %v386_v22 = vpack.c.bf16 %v150_v19, %v149_v18  ;;  %v21_v23 = vld [vmem:[%s681_s0] sm:$0xff]  ;;  %v169_v28 = vld [vmem:[%s684_s3 + $0xf0] sm:$0xff] }
  0x1c   :  { %v388_v24 = vpack.c.bf16 %v168_v21, %v167_v20  ;;  %v151_v25 = vld [vmem:[%s684_s3 + $0x60] sm:$0xff]  ;;  %v152_v26 = vld [vmem:[%s684_s3 + $0x68] sm:$0xff]  ;;  %v170_v29 = vld [vmem:[%s684_s3 + $0xf8] sm:$0xff]  ;;  %p416_p3 = por %p415_p2, %p414_p1 }
  0x1d   :  { %359 = vmatpush1.bf16.msra.mxu0 %v358_v6  ;;  %v390_v27 = vpack.c.bf16 %v152_v26, %v151_v25  ;;  %v392_v30 = vpack.c.bf16 %v170_v29, %v169_v28  ;;  %v153_v31 = vld [vmem:[%s684_s3 + $0x70] sm:$0xff]  ;;  %v154_v32 = vld [vmem:[%s684_s3 + $0x78] sm:$0xff]  ;;  %v54_v37 = vld [vmem:[%s683_s2] sm:$0x3]  ;;  %s434_s2 = smov 120  }
  0x1e   :  { %361 = vmatprep.subr.bf16.mxu0 %v360_v11  ;;  %383 = vmatpush3.bf16.msra.mxu1 %v382_v15  ;;  %v394_v33 = vpack.c.bf16 %v154_v32, %v153_v31  ;;  %v59_v39 = vrot.slane %v54_v37, %v58_v36  ;;  %v63_v40 = vrot.slane %v54_v37, %v62_v38  ;;  %v294_v48 = vld [vmem:[%s685_s4] ss:$0 sm:$0xff]  ;;  %s435_s4 = smov 16   ;;  %p417_p4 = pnand %p416_p3, %p410_p0 }
  0x1f   :  { %385 = vmatprep.subr.bf16.mxu1 %v384_v17 }
  0x21   :  { %363 = vmatpush1.bf16.msra.mxu0 %v362_v16 }
  0x22   :  { %387 = vmatpush3.bf16.msra.mxu1 %v386_v22 }
  0x23   :  { %389 = vmatprep.subr.bf16.mxu1 %v388_v24 }
  0x24   :  { %131 = vmatmul.mubr.f32.vlgmr.msra.gmra.mrb[0].mxu0 %v21_v23 }
  0x26   :  { %391 = vmatpush3.bf16.msra.mxu1 %v390_v27 }
  0x27   :  { %393 = vmatprep.subr.bf16.mxu1 %v392_v30 }
  0x2a   :  { %395 = vmatpush3.bf16.msra.mxu1 %v394_v33 }
  0xf7   :  { %v132_v41 = vpop.f32.mrb[0].mxu0 }
  0xf8   :  { %v133_v42 = vadd.f32 %v132_v41, %v59_v39  ;;  %v134_v43 = vpop.f32.mrb[1].mxu0 }
  0xf9   :  { %v135_v44 = vadd.f32 %v134_v43, %v63_v40 }
  0xfa   :  { %v137_v46 = vmax.f32 %v133_v42, 0.0 }
  0xfb   :  { %v138_v45 = vmax.f32 %v135_v44, 0.0 }
  0xfd   :  { %242 = vmatprep.mubr.f32.mxu1 %v138_v45 }
  0xfe   :  { %243 = vmatmul.mubr.f32.vlgmr.msra.gmra.mrb[0].mxu1 %v137_v46 }
 0x1d1   :  { %v329_v47 = vpop.f32.mrb[0].mxu1 }
 0x1d2   :  { %v330_v49 = vpop.f32.mrb[1].mxu1 }
 0x1d3   :  { %v331_v50 = vadd.f32 %v330_v49, %v329_v47 }
 0x1d5   :  { %v245_v51 = vadd.f32 %v331_v50, %v294_v48 }
 0x1d7   :  { %251 = vrot.lane.b32.xlu0 %v245_v51, %s434_s2  ;;  %249 = vst.msk [vmem:[#allocation2] sm:$0xff] %vm248_vm0, %v245_v51 }
 0x249   :  { %v252_v52 = vpop.permute.xlu0 %251 }
 0x24a   :  { %v254_v53 = vsub.f32 %v245_v51, %v252_v52 }
 0x24c   :  { %v295_v54 = vmul.f32 -1.442695, %v254_v53  ;;  %v267_v55 = vsub.f32 0.0, %v254_v53 }
 0x24e   :  { %401 = vpow2.f32 %v295_v54  ;;  %v296_v56 = vmul.f32 -1.442695, %v267_v55 }
 0x250   :  { %403 = vpow2.f32 %v296_v56 }
 0x258   :  { %v402_v57 = vpop.eup %401 }
 0x259   :  { %v258_v58 = vadd.f32 1.0, %v402_v57 }
 0x25a   :  { %v404_v59 = vpop.eup %403 }
 0x25b   :  { %405 = vrcp.f32 %v258_v58  ;;  %v271_v60 = vadd.f32 1.0, %v404_v59 }
 0x25d   :  { %407 = vrcp.f32 %v271_v60 }
 0x265   :  { %v406_v61 = vpop.eup %405 }
 0x266   :  { %262 = vrot.lane.b32.xlu0 %v406_v61, %s435_s4 }
 0x267   :  { %v408_v62 = vpop.eup %407 }
 0x268   :  { %275 = vrot.lane.b32.xlu1 %v408_v62, %s436_s24 }
 0x2d8   :  { %v263_v63 = vpop.permute.xlu0 %262 }
 0x2d9   :  { %266 = vst.msk [vmem:[#allocation2] sm:$0xff] %vm265_vm1, %v263_v63 }
 0x2da   :  { %v276_v0 = vpop.permute.xlu1 %275 }
 0x2db   :  { %279 = vst.msk [vmem:[#allocation2] sm:$0xff] %vm278_vm2, %v276_v0 }
 0x2dc   :  { %420 = shalt.err (!%p417_p4)
}
 0x2dd   :  { %s421_s29 = scalar_lea.hbm %s686_s5, 128 }
 0x2de   :  { %p422_p5 = scmp.ne.s32.totalorder %s686_s5, %s421_s29  ;;  %p425_p6 = scmp.lt.u32.totalorder %s421_s29, %s686_s5 }
 0x2e0   :  { %p427_p7 = pnand %p425_p6, %p422_p5 }
 0x2e2   :  { %430 = shalt.err (!%p427_p7)
}
 0x2e3   :  { %289 = dma.vmem_to_hbm [thread:$0]  %s287_s26, 128, %s686_s5, [#allocation3]  }
 0x2e4   :  { %431 = dma.done.wait [#allocation3], 128  }
 0x2e5   :  { %432 = vsyncadd [#allocation3], 4294967168 }
 0x2e6   :  { %293 = vsyncpa [#allocation3], 1 }

</bundles_post_ra>
